<compile_context>
chip_gen: v7x
topology: tpu7x:2x2x1
jax: 0.10.0
libtpu: 0.0.40
codegen_flags: <defaults>
</compile_context>

<pallas_src>
import math

import jax
import jax.numpy as jnp
from jax import lax
from jax.experimental import pallas as pl
from jax.experimental.pallas import tpu as pltpu

R_MAX = 5.0          # model.r_max buffer
NUM_BESSEL = 8       # number of Bessel radial basis functions
CUTOFF_P = 6         # MACE PolynomialCutoff default p

# Cutoff polynomial constants, folded at trace time.
_P = float(CUTOFF_P)
_C1 = (_P + 1.0) * (_P + 2.0) / 2.0
_C2 = _P * (_P + 2.0)
_C3 = _P * (_P + 1.0) / 2.0
_INV_RMAX = 1.0 / R_MAX
_PI_OVER_RMAX = math.pi / R_MAX
_BESSEL_PREF = math.sqrt(2.0 / R_MAX)


def _make_edge_kernel(c_pref, kc_pref):
    """Build the per-tile kernel with the radial readout coefficients baked in.

    c_pref[k-1]  = sqrt(2/r_max) * c_k          (Python floats)
    kc_pref[k-1] = k * sqrt(2/r_max) * c_k      (Python floats)

    Kernel refs:
      in_ref  : [4, rt, 128]  rows: vx, vy, vz, q_e   (edges dense over sublanes/lanes)
      out_ref : [4, rt, 128]  rows: fx, fy, fz, e_edge
    """

    def kernel(in_ref, out_ref):
        vx = in_ref[0]                                          # [rt, 128]
        vy = in_ref[1]
        vz = in_ref[2]
        q = in_ref[3]

        r2 = vx * vx + vy * vy + vz * vz                        # [rt, 128]
        valid = r2 > 1e-12                                      # padded edges are zero vectors
        r2s = jnp.where(valid, r2, 1.0)
        inv_r = lax.rsqrt(r2s)                                  # single EUP rsqrt
        r = r2s * inv_r
        inv_r2 = inv_r * inv_r

        # --- Bessel basis via angle-addition recurrence (2 transcendentals total) ---
        theta = r * _PI_OVER_RMAX
        s1 = jnp.sin(theta)
        c1 = jnp.cos(theta)
        sk, ck = s1, c1
        s_c = c_pref[0] * sk                                    # sum_k c'_k sin(k theta)
        s_kc = kc_pref[0] * ck                                  # sum_k k c'_k cos(k theta)
        for k in range(2, NUM_BESSEL + 1):
            sk, ck = sk * c1 + ck * s1, ck * c1 - sk * s1       # angle addition (old sk/ck on RHS)
            s_c = s_c + c_pref[k - 1] * sk
            s_kc = s_kc + kc_pref[k - 1] * ck

        # --- Polynomial cutoff envelope (p = 6) + derivative, Horner-factored --------
        x = r * _INV_RMAX
        x2 = x * x
        x4 = x2 * x2
        x5 = x4 * x
        x6 = x5 * x
        inside = x < 1.0
        f_cut = jnp.where(inside, 1.0 - x6 * (_C1 - _C2 * x + _C3 * x2), 0.0)
        df_cut = jnp.where(
            inside, -(x5 * (6.0 * _C1 - 7.0 * _C2 * x + 8.0 * _C3 * x2)) * _INV_RMAX, 0.0)

        # --- radial readout phi(r), d phi / d r ---------------------------------------
        phi_r = s_c * inv_r                                     # sum_k c_k b_k
        dsum = _PI_OVER_RMAX * inv_r * s_kc - inv_r2 * s_c      # sum_k c_k db_k
        phi = phi_r * f_cut
        dphi = dsum * f_cut + phi_r * df_cut

        e_edge = jnp.where(valid, phi * q, 0.0)
        coef = jnp.where(valid, -(dphi * q) * inv_r, 0.0)
        out_ref[0] = coef * vx
        out_ref[1] = coef * vy
        out_ref[2] = coef * vz
        out_ref[3] = e_edge

    return kernel


def _round_up(x, m):
    return x + ((-x) % m)


class MACEEdgeForcesWrapperPallas:
    """Pallas version of MACEEdgeForcesWrapper: returns (total_energy, node_energy, pair_forces)."""

    def __init__(self, num_species=4, hidden=32, seed=0, max_rows=128):
        key = jax.random.PRNGKey(seed)
        k1, k2, k3, k4 = jax.random.split(key, 4)
        self.num_species = num_species
        self.max_rows = max_rows                                 # 128 rows x 128 lanes = 16384 edges/tile
        # deterministic synthetic parameters (shapes implied by a MACE-style model)
        self.W_embed = 0.1 * jax.random.normal(k1, (num_species, hidden), jnp.float32)
        self.w_readout = 0.1 * jax.random.normal(k2, (hidden,), jnp.float32)
        self.E0 = jax.random.normal(k3, (num_species,), jnp.float32)        # atomic energies
        self.c_bessel = 0.5 * jax.random.normal(k4, (NUM_BESSEL,), jnp.float32)
        self.head = jnp.array([0], dtype=jnp.int32)                         # 'head' buffer
        # composed per-species readout scalar  <w_readout, W_embed[z]>
        self.w_eq = self.W_embed @ self.w_readout                           # [S]
        # bake prefactor-folded readout coefficients as Python floats (no VMEM inputs)
        c_list = [float(v) * _BESSEL_PREF for v in self.c_bessel]
        self._c_pref = tuple(c_list)
        self._kc_pref = tuple(float(k + 1) * c_list[k] for k in range(NUM_BESSEL))
        self._kernel = _make_edge_kernel(self._c_pref, self._kc_pref)

    def __call__(self, data):
        data = dict(data)
        data['head'] = self.head                                            # mirrors wrapper

        node_attrs = data['node_attrs'].astype(jnp.float32)                 # [N, S]
        vectors = data['vectors'].astype(jnp.float32)                       # [E, 3]
        edge_index = data['edge_index']                                     # [2, E]
        N, _ = node_attrs.shape
        E = vectors.shape[0]
        senders = edge_index[0]
        receivers = edge_index[1]

        # --- cheap glue: species readouts stay out of the kernel (O(N*S) / O(E)) ---
        q_node = node_attrs @ self.w_eq                                     # [N]
        node_self = node_attrs @ (self.E0 + self.w_eq)                      # [N]
        q_e = q_node[senders]                                               # [E]

        # --- edge-dense [4, R, 128] layout ------------------------------------------
        rows_needed = pl.cdiv(max(E, 1), 128)
        # tile rows: multiple of 8, at most max_rows, and aim for >= 2 grid steps when
        # E is large so the "parallel" axis shards across v7x's two TensorCores.
        rt = min(self.max_rows, _round_up(max(rows_needed // 2, 1), 8))
        rt = max(rt, 8)
        R = _round_up(rows_needed, rt)
        Ep = R * 128

        packed = jnp.concatenate([vectors.T, q_e[None, :]], axis=0)         # [4, E]
        packed = jnp.pad(packed, ((0, 0), (0, Ep - E))).reshape(4, R, 128)  # [4, R, 128]

        grid = (R // rt,)
        out = pl.pallas_call(
            self._kernel,
            out_shape=jax.ShapeDtypeStruct((4, R, 128), jnp.float32),
            grid_spec=pltpu.PrefetchScalarGridSpec(
                num_scalar_prefetch=0,
                grid=grid,
                in_specs=[pl.BlockSpec((4, rt, 128), lambda i: (0, i, 0))],
                out_specs=pl.BlockSpec((4, rt, 128), lambda i: (0, i, 0)),
            ),
            compiler_params=pltpu.CompilerParams(
                dimension_semantics=("parallel",)),
            cost_estimate=pl.CostEstimate(
                flops=80 * Ep, transcendentals=3 * Ep, bytes_accessed=32 * Ep),
        )(packed)

        out_flat = out.reshape(4, Ep)
        pair_forces = out_flat[:3, :E].T                                    # [E, 3]
        edge_energy = out_flat[3, :E]                                       # [E]

        # O(E) edge->node scatter in glue (see TODO(synk) at top for large-E strategy)
        msg = jnp.zeros(N, jnp.float32).at[receivers].add(edge_energy)
        node_energy = node_self + msg                                       # [N]
        total_energy = jnp.sum(node_energy)                                 # scalar
        return total_energy, node_energy, pair_forces


def _reference(model, data):
    """Pure-JAX reference of the same synthetic MACE-style energy/force model."""
    node_attrs = data['node_attrs'].astype(jnp.float32)
    vectors = data['vectors'].astype(jnp.float32)
    senders, receivers = data['edge_index']
    N = node_attrs.shape[0]

    r = jnp.linalg.norm(vectors, axis=-1)                                   # [E]
    k = jnp.arange(1, NUM_BESSEL + 1, dtype=jnp.float32)
    a = k * jnp.pi / R_MAX
    pref = jnp.sqrt(2.0 / R_MAX)
    ar = a * r[:, None]
    bess = pref * jnp.sin(ar) / r[:, None]
    dbess = pref * (a * jnp.cos(ar) * r[:, None] - jnp.sin(ar)) / (r[:, None] ** 2)

    x = r / R_MAX
    p = float(CUTOFF_P)
    c1 = (p + 1) * (p + 2) / 2.0
    c2 = p * (p + 2)
    c3 = p * (p + 1) / 2.0
    f = jnp.where(x < 1, 1 - c1 * x**6 + c2 * x**7 - c3 * x**8, 0.0)
    df = jnp.where(x < 1, (-6 * c1 * x**5 + 7 * c2 * x**6 - 8 * c3 * x**7) / R_MAX, 0.0)

    phi = (bess * f[:, None]) @ model.c_bessel
    dphi = (dbess * f[:, None] + bess * df[:, None]) @ model.c_bessel

    q_node = node_attrs @ model.w_eq
    q_e = q_node[senders]

    edge_energy = phi * q_e
    pair_forces = -(dphi * q_e / r)[:, None] * vectors

    node_self = node_attrs @ (model.E0 + model.w_eq)
    msg = jnp.zeros(N, jnp.float32).at[receivers].add(edge_energy)
    node_energy = node_self + msg
    total_energy = jnp.sum(node_energy)
    return total_energy, node_energy, pair_forces


if __name__ == "__main__":
    key = jax.random.PRNGKey(0)
    N, S, E = 8, 4, 16
    kz, kv, ks, kr = jax.random.split(key, 4)
    species = jax.random.randint(kz, (N,), 0, S)
    node_attrs = jax.nn.one_hot(species, S, dtype=jnp.float32)
    vectors = jax.random.uniform(kv, (E, 3), jnp.float32, minval=-2.5, maxval=2.5)
    senders = jax.random.randint(ks, (E,), 0, N)
    receivers = jax.random.randint(kr, (E,), 0, N)
    edge_index = jnp.stack([senders, receivers])
    data = {'node_attrs': node_attrs, 'vectors': vectors, 'edge_index': edge_index}

    model = MACEEdgeForcesWrapperPallas(num_species=S, hidden=32, seed=0)
    total_e, node_e, pair_f = model(data)
    jax.block_until_ready((total_e, node_e, pair_f))

    rt, rn, rf = _reference(model, data)
    assert total_e.shape == () and node_e.shape == (N,) and pair_f.shape == (E, 3)
    assert jnp.allclose(total_e, rt, rtol=1e-4, atol=1e-4)
    assert jnp.allclose(node_e, rn, rtol=1e-4, atol=1e-4)
    assert jnp.allclose(pair_f, rf, rtol=1e-4, atol=1e-4)
    print("KERNEL_OK")
</pallas_src>

<mosaic_0001>
module attributes {stable_mosaic.version = 11 : i64} {
  func.func @kernel(%arg0: i32, %arg1: memref<4x8x128xf32, #tpu.memory_space<vmem>>, %arg2: memref<4x8x128xf32, #tpu.memory_space<vmem>>) attributes {dimension_semantics = [#tpu.dimension_semantics<parallel>], iteration_bounds = array<i64: 1>, scalar_prefetch = 0 : i64, scratch_operands = 0 : i64, tpu.core_type = #tpu.core_type<tc>, window_params = [{transform_indices = @transform_0, window_bounds = array<i64: 4, 8, 128>}, {transform_indices = @transform_1, window_bounds = array<i64: 4, 8, 128>}]} {
    %c0 = arith.constant 0 : index
    %c0_0 = arith.constant 0 : index
    %c0_1 = arith.constant 0 : index
    %0 = vector.load %arg1[%c0, %c0_0, %c0_1] : memref<4x8x128xf32, #tpu.memory_space<vmem>>, vector<1x8x128xf32>
    %1 = vector.shape_cast %0 : vector<1x8x128xf32> to vector<8x128xf32>
    %c1 = arith.constant 1 : index
    %c0_2 = arith.constant 0 : index
    %c0_3 = arith.constant 0 : index
    %2 = vector.load %arg1[%c1, %c0_2, %c0_3] : memref<4x8x128xf32, #tpu.memory_space<vmem>>, vector<1x8x128xf32>
    %3 = vector.shape_cast %2 : vector<1x8x128xf32> to vector<8x128xf32>
    %c2 = arith.constant 2 : index
    %c0_4 = arith.constant 0 : index
    %c0_5 = arith.constant 0 : index
    %4 = vector.load %arg1[%c2, %c0_4, %c0_5] : memref<4x8x128xf32, #tpu.memory_space<vmem>>, vector<1x8x128xf32>
    %5 = vector.shape_cast %4 : vector<1x8x128xf32> to vector<8x128xf32>
    %c3 = arith.constant 3 : index
    %c0_6 = arith.constant 0 : index
    %c0_7 = arith.constant 0 : index
    %6 = vector.load %arg1[%c3, %c0_6, %c0_7] : memref<4x8x128xf32, #tpu.memory_space<vmem>>, vector<1x8x128xf32>
    %7 = vector.shape_cast %6 : vector<1x8x128xf32> to vector<8x128xf32>
    %8 = arith.mulf %1, %1 : vector<8x128xf32>
    %9 = arith.mulf %3, %3 : vector<8x128xf32>
    %10 = arith.addf %8, %9 : vector<8x128xf32>
    %11 = arith.mulf %5, %5 : vector<8x128xf32>
    %12 = arith.addf %10, %11 : vector<8x128xf32>
    %cst = arith.constant 9.99999996E-13 : f32
    %13 = vector.broadcast %cst : f32 to vector<8x128xf32>
    %14 = arith.cmpf ogt, %12, %13 : vector<8x128xf32>
    %cst_8 = arith.constant 1.000000e+00 : f32
    %15 = vector.broadcast %cst_8 : f32 to vector<8x128xf32>
    %16 = arith.select %14, %12, %15 : vector<8x128xi1>, vector<8x128xf32>
    %17 = math.rsqrt %16 : vector<8x128xf32>
    %18 = arith.mulf %16, %17 : vector<8x128xf32>
    %19 = arith.mulf %17, %17 : vector<8x128xf32>
    %cst_9 = arith.constant 0.628318548 : f32
    %20 = vector.broadcast %cst_9 : f32 to vector<8x128xf32>
    %21 = arith.mulf %18, %20 : vector<8x128xf32>
    %22 = math.sin %21 : vector<8x128xf32>
    %23 = math.cos %21 : vector<8x128xf32>
    %cst_10 = arith.constant -0.196675837 : f32
    %24 = vector.broadcast %cst_10 : f32 to vector<8x128xf32>
    %25 = arith.mulf %24, %22 : vector<8x128xf32>
    %cst_11 = arith.constant -0.196675837 : f32
    %26 = vector.broadcast %cst_11 : f32 to vector<8x128xf32>
    %27 = arith.mulf %26, %23 : vector<8x128xf32>
    %28 = arith.mulf %22, %23 : vector<8x128xf32>
    %29 = arith.mulf %23, %22 : vector<8x128xf32>
    %30 = arith.addf %28, %29 : vector<8x128xf32>
    %31 = arith.mulf %23, %23 : vector<8x128xf32>
    %32 = arith.mulf %22, %22 : vector<8x128xf32>
    %33 = arith.subf %31, %32 : vector<8x128xf32>
    %cst_12 = arith.constant 0.197580397 : f32
    %34 = vector.broadcast %cst_12 : f32 to vector<8x128xf32>
    %35 = arith.mulf %34, %30 : vector<8x128xf32>
    %36 = arith.addf %25, %35 : vector<8x128xf32>
    %cst_13 = arith.constant 0.395160794 : f32
    %37 = vector.broadcast %cst_13 : f32 to vector<8x128xf32>
    %38 = arith.mulf %37, %33 : vector<8x128xf32>
    %39 = arith.addf %27, %38 : vector<8x128xf32>
    %40 = arith.mulf %30, %23 : vector<8x128xf32>
    %41 = arith.mulf %33, %22 : vector<8x128xf32>
    %42 = arith.addf %40, %41 : vector<8x128xf32>
    %43 = arith.mulf %33, %23 : vector<8x128xf32>
    %44 = arith.mulf %30, %22 : vector<8x128xf32>
    %45 = arith.subf %43, %44 : vector<8x128xf32>
    %cst_14 = arith.constant 0.531919599 : f32
    %46 = vector.broadcast %cst_14 : f32 to vector<8x128xf32>
    %47 = arith.mulf %46, %42 : vector<8x128xf32>
    %48 = arith.addf %36, %47 : vector<8x128xf32>
    %cst_15 = arith.constant 1.59575891 : f32
    %49 = vector.broadcast %cst_15 : f32 to vector<8x128xf32>
    %50 = arith.mulf %49, %45 : vector<8x128xf32>
    %51 = arith.addf %39, %50 : vector<8x128xf32>
    %52 = arith.mulf %42, %23 : vector<8x128xf32>
    %53 = arith.mulf %45, %22 : vector<8x128xf32>
    %54 = arith.addf %52, %53 : vector<8x128xf32>
    %55 = arith.mulf %45, %23 : vector<8x128xf32>
    %56 = arith.mulf %42, %22 : vector<8x128xf32>
    %57 = arith.subf %55, %56 : vector<8x128xf32>
    %cst_16 = arith.constant -0.255516082 : f32
    %58 = vector.broadcast %cst_16 : f32 to vector<8x128xf32>
    %59 = arith.mulf %58, %54 : vector<8x128xf32>
    %60 = arith.addf %48, %59 : vector<8x128xf32>
    %cst_17 = arith.constant -1.02206433 : f32
    %61 = vector.broadcast %cst_17 : f32 to vector<8x128xf32>
    %62 = arith.mulf %61, %57 : vector<8x128xf32>
    %63 = arith.addf %51, %62 : vector<8x128xf32>
    %64 = arith.mulf %54, %23 : vector<8x128xf32>
    %65 = arith.mulf %57, %22 : vector<8x128xf32>
    %66 = arith.addf %64, %65 : vector<8x128xf32>
    %67 = arith.mulf %57, %23 : vector<8x128xf32>
    %68 = arith.mulf %54, %22 : vector<8x128xf32>
    %69 = arith.subf %67, %68 : vector<8x128xf32>
    %cst_18 = arith.constant -0.748263776 : f32
    %70 = vector.broadcast %cst_18 : f32 to vector<8x128xf32>
    %71 = arith.mulf %70, %66 : vector<8x128xf32>
    %72 = arith.addf %60, %71 : vector<8x128xf32>
    %cst_19 = arith.constant -3.74131894 : f32
    %73 = vector.broadcast %cst_19 : f32 to vector<8x128xf32>
    %74 = arith.mulf %73, %69 : vector<8x128xf32>
    %75 = arith.addf %63, %74 : vector<8x128xf32>
    %76 = arith.mulf %66, %23 : vector<8x128xf32>
    %77 = arith.mulf %69, %22 : vector<8x128xf32>
    %78 = arith.addf %76, %77 : vector<8x128xf32>
    %79 = arith.mulf %69, %23 : vector<8x128xf32>
    %80 = arith.mulf %66, %22 : vector<8x128xf32>
    %81 = arith.subf %79, %80 : vector<8x128xf32>
    %cst_20 = arith.constant 0.283323109 : f32
    %82 = vector.broadcast %cst_20 : f32 to vector<8x128xf32>
    %83 = arith.mulf %82, %78 : vector<8x128xf32>
    %84 = arith.addf %72, %83 : vector<8x128xf32>
    %cst_21 = arith.constant 1.69993865 : f32
    %85 = vector.broadcast %cst_21 : f32 to vector<8x128xf32>
    %86 = arith.mulf %85, %81 : vector<8x128xf32>
    %87 = arith.addf %75, %86 : vector<8x128xf32>
    %88 = arith.mulf %78, %23 : vector<8x128xf32>
    %89 = arith.mulf %81, %22 : vector<8x128xf32>
    %90 = arith.addf %88, %89 : vector<8x128xf32>
    %91 = arith.mulf %81, %23 : vector<8x128xf32>
    %92 = arith.mulf %78, %22 : vector<8x128xf32>
    %93 = arith.subf %91, %92 : vector<8x128xf32>
    %cst_22 = arith.constant 0.462580353 : f32
    %94 = vector.broadcast %cst_22 : f32 to vector<8x128xf32>
    %95 = arith.mulf %94, %90 : vector<8x128xf32>
    %96 = arith.addf %84, %95 : vector<8x128xf32>
    %cst_23 = arith.constant 3.23806262 : f32
    %97 = vector.broadcast %cst_23 : f32 to vector<8x128xf32>
    %98 = arith.mulf %97, %93 : vector<8x128xf32>
    %99 = arith.addf %87, %98 : vector<8x128xf32>
    %100 = arith.mulf %90, %23 : vector<8x128xf32>
    %101 = arith.mulf %93, %22 : vector<8x128xf32>
    %102 = arith.addf %100, %101 : vector<8x128xf32>
    %103 = arith.mulf %93, %23 : vector<8x128xf32>
    %104 = arith.mulf %90, %22 : vector<8x128xf32>
    %105 = arith.subf %103, %104 : vector<8x128xf32>
    %cst_24 = arith.constant -0.188322723 : f32
    %106 = vector.broadcast %cst_24 : f32 to vector<8x128xf32>
    %107 = arith.mulf %106, %102 : vector<8x128xf32>
    %108 = arith.addf %96, %107 : vector<8x128xf32>
    %cst_25 = arith.constant -1.50658178 : f32
    %109 = vector.broadcast %cst_25 : f32 to vector<8x128xf32>
    %110 = arith.mulf %109, %105 : vector<8x128xf32>
    %111 = arith.addf %99, %110 : vector<8x128xf32>
    %cst_26 = arith.constant 2.000000e-01 : f32
    %112 = vector.broadcast %cst_26 : f32 to vector<8x128xf32>
    %113 = arith.mulf %18, %112 : vector<8x128xf32>
    %114 = arith.mulf %113, %113 : vector<8x128xf32>
    %115 = arith.mulf %114, %114 : vector<8x128xf32>
    %116 = arith.mulf %115, %113 : vector<8x128xf32>
    %117 = arith.mulf %116, %113 : vector<8x128xf32>
    %cst_27 = arith.constant 1.000000e+00 : f32
    %118 = vector.broadcast %cst_27 : f32 to vector<8x128xf32>
    %119 = arith.cmpf olt, %113, %118 : vector<8x128xf32>
    %cst_28 = arith.constant 4.800000e+01 : f32
    %120 = vector.broadcast %cst_28 : f32 to vector<8x128xf32>
    %121 = arith.mulf %120, %113 : vector<8x128xf32>
    %cst_29 = arith.constant 2.800000e+01 : f32
    %122 = vector.broadcast %cst_29 : f32 to vector<8x128xf32>
    %123 = arith.subf %122, %121 : vector<8x128xf32>
    %cst_30 = arith.constant 2.100000e+01 : f32
    %124 = vector.broadcast %cst_30 : f32 to vector<8x128xf32>
    %125 = arith.mulf %124, %114 : vector<8x128xf32>
    %126 = arith.addf %123, %125 : vector<8x128xf32>
    %127 = arith.mulf %117, %126 : vector<8x128xf32>
    %cst_31 = arith.constant 1.000000e+00 : f32
    %128 = vector.broadcast %cst_31 : f32 to vector<8x128xf32>
    %129 = arith.subf %128, %127 : vector<8x128xf32>
    %cst_32 = arith.constant 0.000000e+00 : f32
    %130 = vector.broadcast %cst_32 : f32 to vector<8x128xf32>
    %131 = arith.select %119, %129, %130 : vector<8x128xi1>, vector<8x128xf32>
    %cst_33 = arith.constant 3.360000e+02 : f32
    %132 = vector.broadcast %cst_33 : f32 to vector<8x128xf32>
    %133 = arith.mulf %132, %113 : vector<8x128xf32>
    %cst_34 = arith.constant 1.680000e+02 : f32
    %134 = vector.broadcast %cst_34 : f32 to vector<8x128xf32>
    %135 = arith.subf %134, %133 : vector<8x128xf32>
    %cst_35 = arith.constant 1.680000e+02 : f32
    %136 = vector.broadcast %cst_35 : f32 to vector<8x128xf32>
    %137 = arith.mulf %136, %114 : vector<8x128xf32>
    %138 = arith.addf %135, %137 : vector<8x128xf32>
    %139 = arith.mulf %116, %138 : vector<8x128xf32>
    %cst_36 = arith.constant 0.000000e+00 : f32
    %140 = vector.broadcast %cst_36 : f32 to vector<8x128xf32>
    %141 = arith.subf %140, %139 : vector<8x128xf32>
    %cst_37 = arith.constant 2.000000e-01 : f32
    %142 = vector.broadcast %cst_37 : f32 to vector<8x128xf32>
    %143 = arith.mulf %141, %142 : vector<8x128xf32>
    %cst_38 = arith.constant 0.000000e+00 : f32
    %144 = vector.broadcast %cst_38 : f32 to vector<8x128xf32>
    %145 = arith.select %119, %143, %144 : vector<8x128xi1>, vector<8x128xf32>
    %146 = arith.mulf %108, %17 : vector<8x128xf32>
    %cst_39 = arith.constant 0.628318548 : f32
    %147 = vector.broadcast %cst_39 : f32 to vector<8x128xf32>
    %148 = arith.mulf %147, %17 : vector<8x128xf32>
    %149 = arith.mulf %148, %111 : vector<8x128xf32>
    %150 = arith.mulf %19, %108 : vector<8x128xf32>
    %151 = arith.subf %149, %150 : vector<8x128xf32>
    %152 = arith.mulf %146, %131 : vector<8x128xf32>
    %153 = arith.mulf %151, %131 : vector<8x128xf32>
    %154 = arith.mulf %146, %145 : vector<8x128xf32>
    %155 = arith.addf %153, %154 : vector<8x128xf32>
    %156 = arith.mulf %152, %7 : vector<8x128xf32>
    %cst_40 = arith.constant 0.000000e+00 : f32
    %157 = vector.broadcast %cst_40 : f32 to vector<8x128xf32>
    %158 = arith.select %14, %156, %157 : vector<8x128xi1>, vector<8x128xf32>
    %159 = arith.mulf %155, %7 : vector<8x128xf32>
    %cst_41 = arith.constant 0.000000e+00 : f32
    %160 = vector.broadcast %cst_41 : f32 to vector<8x128xf32>
    %161 = arith.subf %160, %159 : vector<8x128xf32>
    %162 = arith.mulf %161, %17 : vector<8x128xf32>
    %cst_42 = arith.constant 0.000000e+00 : f32
    %163 = vector.broadcast %cst_42 : f32 to vector<8x128xf32>
    %164 = arith.select %14, %162, %163 : vector<8x128xi1>, vector<8x128xf32>
    %165 = arith.mulf %164, %1 : vector<8x128xf32>
    %c0_43 = arith.constant 0 : index
    %c0_44 = arith.constant 0 : index
    %c0_45 = arith.constant 0 : index
    %166 = vector.load %arg2[%c0_43, %c0_44, %c0_45] : memref<4x8x128xf32, #tpu.memory_space<vmem>>, vector<1x8x128xf32>
    %167 = vector.shape_cast %166 : vector<1x8x128xf32> to vector<8x128xf32>
    %168 = vector.shape_cast %165 : vector<8x128xf32> to vector<1x8x128xf32>
    tpu.vector_store %arg2[%c0_43, %c0_44, %c0_45], %168 {strides = array<i32>} : memref<4x8x128xf32, #tpu.memory_space<vmem>>, vector<1x8x128xf32>,
    %169 = arith.mulf %164, %3 : vector<8x128xf32>
    %c1_46 = arith.constant 1 : index
    %c0_47 = arith.constant 0 : index
    %c0_48 = arith.constant 0 : index
    %170 = vector.load %arg2[%c1_46, %c0_47, %c0_48] : memref<4x8x128xf32, #tpu.memory_space<vmem>>, vector<1x8x128xf32>
    %171 = vector.shape_cast %170 : vector<1x8x128xf32> to vector<8x128xf32>
    %172 = vector.shape_cast %169 : vector<8x128xf32> to vector<1x8x128xf32>
    tpu.vector_store %arg2[%c1_46, %c0_47, %c0_48], %172 {strides = array<i32>} : memref<4x8x128xf32, #tpu.memory_space<vmem>>, vector<1x8x128xf32>,
    %173 = arith.mulf %164, %5 : vector<8x128xf32>
    %c2_49 = arith.constant 2 : index
    %c0_50 = arith.constant 0 : index
    %c0_51 = arith.constant 0 : index
    %174 = vector.load %arg2[%c2_49, %c0_50, %c0_51] : memref<4x8x128xf32, #tpu.memory_space<vmem>>, vector<1x8x128xf32>
    %175 = vector.shape_cast %174 : vector<1x8x128xf32> to vector<8x128xf32>
    %176 = vector.shape_cast %173 : vector<8x128xf32> to vector<1x8x128xf32>
    tpu.vector_store %arg2[%c2_49, %c0_50, %c0_51], %176 {strides = array<i32>} : memref<4x8x128xf32, #tpu.memory_space<vmem>>, vector<1x8x128xf32>,
    %c3_52 = arith.constant 3 : index
    %c0_53 = arith.constant 0 : index
    %c0_54 = arith.constant 0 : index
    %177 = vector.load %arg2[%c3_52, %c0_53, %c0_54] : memref<4x8x128xf32, #tpu.memory_space<vmem>>, vector<1x8x128xf32>
    %178 = vector.shape_cast %177 : vector<1x8x128xf32> to vector<8x128xf32>
    %179 = vector.shape_cast %158 : vector<8x128xf32> to vector<1x8x128xf32>
    tpu.vector_store %arg2[%c3_52, %c0_53, %c0_54], %179 {strides = array<i32>} : memref<4x8x128xf32, #tpu.memory_space<vmem>>, vector<1x8x128xf32>,
    return
  }
  func.func @transform_0(%arg0: i32) -> (i32, i32, i32) {
    %c0_i32 = arith.constant 0 : i32
    %c0_i32_0 = arith.constant 0 : i32
    %c0_i32_1 = arith.constant 0 : i32
    return %c0_i32, %arg0, %c0_i32_0 : i32, i32, i32
  }
  func.func @transform_1(%arg0: i32) -> (i32, i32, i32) {
    %c0_i32 = arith.constant 0 : i32
    %c0_i32_0 = arith.constant 0 : i32
    %c0_i32_1 = arith.constant 0 : i32
    return %c0_i32, %arg0, %c0_i32_0 : i32, i32, i32
  }
}

</mosaic_0001>

<bundles_post_ra>
// kernel: tpu_custom_call.1
= control target key start
LH: loop header
LB: loop body
LE: loop exit
PB: predicated region body
PF: predicated region fallthrough
CT: control target
= control target key end

     0   :  { %6 = vsyncpa [#allocation3], 0  ;;  %s611_s0 = inlined_call_operand.hbm [shape: f32[4,8,128], index: 0, kind: input, shape index: {}]   ;;  %s612_s1 = inlined_call_operand.hbm [shape: f32[4,8,128], index: 1, kind: output, shape index: {}]  }
   0x1   :  { %7 = vsyncpa [#allocation4], 0  ;;  %s458_s6 = smov [#allocation2]   ;;  %s410_s10 = scalar_lea.hbm %s611_s0, 512 }
   0x2   :  { %s13_s7 = sshll.u32 %s458_s6, 4  ;;  %p411_p0 = scmp.ne.s32.totalorder %s611_s0, %s410_s10  ;;  %s14_s7 = int_to_ptr.vmem [resolvable:$true] %s13_s7 }
   0x3   :  { %p414_p1 = scmp.lt.u32.totalorder %s410_s10, %s611_s0 }
   0x5   :  { %p416_p2 = pnand %p414_p1, %p411_p0 }
   0x7   :  { %419 = shalt.err (!%p416_p2)
}
   0x8   :  { %s420_s15 = scalar_lea.vmem %s14_s7, 512  ;;  %p425_p4 = scmp.lt.s32.totalorder %s14_s7, %s14_s7 }
   0x9   :  { %p421_p3 = scmp.ne.s32.totalorder %s14_s7, %s420_s15  ;;  %p426_p5 = scmp.lt.s32.totalorder %s420_s15, %s420_s15 }
   0xb   :  { %p427_p6 = por %p426_p5, %p425_p4 }
   0xd   :  { %p428_p7 = pnand %p427_p6, %p421_p3 }
   0xf   :  { %431 = shalt.err (!%p428_p7)
}
  0x10   :  { %s459_s16 = smov 128   ;;  %s460_s17 = smov 8  }
  0x11   :  { %19 = dma.hbm_to_vmem [thread:$0]  %s611_s0, 512, %s14_s7, [#allocation3], %s459_s16, %s459_s16, %s460_s17  }
  0x12   :  { %454 = dma.done.wait [#allocation3], 512  }
  0x13   :  { %455 = vsyncadd [#allocation3], 4294966784  ;;  %v493_v0 = vld [vmem:[#allocation2] sm:$0xff]  ;;  %v495_v1 = vld [vmem:[#allocation2 + $0x8] sm:$0xff]  ;;  %v461_v23 = vmov 683565275  }
  0x14   :  { %v497_v2 = vld [vmem:[#allocation2 + $0x10] sm:$0xff]  ;;  %v30_v3 = vmul.f32 %v493_v0, %v493_v0  ;;  %v31_v4 = vmul.f32 %v495_v1, %v495_v1  ;;  %v462_v25 = vmov 2475754826   ;;  %v463_v27 = vmov 2131351028   ;;  %s467_s0 = smov [#allocation5]  }
  0x15   :  { %v33_v5 = vmul.f32 %v497_v2, %v497_v2  ;;  %v464_v29 = vmov 2102212464   ;;  %v465_v31 = vmov 920167782   ;;  %v466_v38 = vmov 1326507024  }
  0x16   :  { %v32_v6 = vadd.f32 %v31_v4, %v30_v3  ;;  %s370_s20 = sshll.u32 %s467_s0, 4  ;;  %s371_s20 = int_to_ptr.vmem [resolvable:$true] %s370_s20 }
  0x17   :  { %s432_s21 = scalar_lea.vmem %s371_s20, 512  ;;  %p437_p9 = scmp.lt.s32.totalorder %s371_s20, %s371_s20 }
  0x18   :  { %v505_v7 = vadd.f32 %v33_v5, %v32_v6  ;;  %p433_p8 = scmp.ne.s32.totalorder %s371_s20, %s432_s21  ;;  %p438_p10 = scmp.lt.s32.totalorder %s432_s21, %s432_s21 }
  0x1a   :  { %vm35_vm0 = vcmp.gt.f32.partialorder %v505_v7, 1e-12  ;;  %p439_p11 = por %p438_p10, %p437_p9 }
  0x1b   :  { %v36_v8 = vsel %vm35_vm0, %v505_v7, 1.0 }
  0x1c   :  { %404 = vrsqrt.f32 %v36_v8  ;;  %p440_p12 = pnand %p439_p11, %p433_p8 }
  0x26   :  { %v511_v9 = vpop.eup %404 }
  0x27   :  { %v514_v10 = vmul.f32 %v511_v9, %v36_v8 }
  0x29   :  { %v517_v11 = vmul.f32 0.62831855, %v514_v10 }
  0x2b   :  { %v44_v12 = vand.u32 2139095040, %v517_v11  ;;  %v41_v14 = vand.u32 2147483647, %v517_v11  ;;  %vm43_vm8 = vcmp.lt.s32.totalorder %v517_v11, 0 }
  0x2d   :  { %v45_v13 = vshrl.u32 %v44_v12, 23  ;;  %v48_v17 = vand.u32 8388607, %v41_v14  ;;  %vm42_vm9 = vcmp.le.f32.partialorder %v41_v14, 0.7853982 }
  0x2f   :  { %v382_v15 = vadd.s32 4294967169, %v45_v13  ;;  %v49_v20 = vor.u32 8388608, %v48_v17 }
  0x31   :  { %v51_v16 = vadd.s32 1, %v382_v15  ;;  %v89_v40 = vshll.u32 %v49_v20, 8 }
  0x33   :  { %vm52_vm1 = vcmp.gt.s32.totalorder %v51_v16, 0 }
  0x34   :  { %v53_v18 = vsel %vm52_vm1, %v51_v16, 0  ;;  %vm133_vm1 = vweird.f32 %v517_v11 }
  0x35   :  { %v55_v19 = vand.u32 31, %v53_v18  ;;  %v54_v21 = vshrl.u32 %v53_v18, 5 }
  0x37   :  { %v56_v22 = vsub.s32 32, %v55_v19  ;;  %v58_v24 = vshll.u32 %v461_v23, %v55_v19  ;;  %v61_v26 = vshll.u32 %v462_v25, %v55_v19  ;;  %v64_v28 = vshll.u32 %v463_v27, %v55_v19 }
  0x38   :  { %v67_v30 = vshll.u32 %v464_v29, %v55_v19  ;;  %v70_v32 = vshll.u32 %v465_v31, %v55_v19  ;;  %vm73_vm2 = vcmp.lt.s32.totalorder %v54_v21, 1  ;;  %vm76_vm3 = vcmp.lt.s32.totalorder %v54_v21, 4 }
  0x39   :  { %v57_v33 = vshrl.u32 %v461_v23, %v56_v22  ;;  %v59_v34 = vshrl.u32 %v462_v25, %v56_v22  ;;  %v62_v35 = vshrl.u32 %v463_v27, %v56_v22  ;;  %v65_v36 = vshrl.u32 %v464_v29, %v56_v22 }
  0x3a   :  { %v68_v37 = vshrl.u32 %v465_v31, %v56_v22  ;;  %v71_v39 = vshrl.u32 %v466_v38, %v56_v22  ;;  %vm74_vm4 = vcmp.lt.s32.totalorder %v54_v21, 2  ;;  %vm75_vm5 = vcmp.lt.s32.totalorder %v54_v21, 3 }
  0x3b   :  { %v60_v41 = vor.u32 %v59_v34, %v58_v24  ;;  %v63_v42 = vor.u32 %v62_v35, %v61_v26  ;;  %v66_v43 = vor.u32 %v65_v36, %v64_v28 }
  0x3c   :  { %v69_v44 = vor.u32 %v68_v37, %v67_v30  ;;  %v72_v45 = vor.u32 %v71_v39, %v70_v32 }
  0x3d   :  { %v77_v46 = vsel %vm73_vm2, %v57_v33, %v60_v41  ;;  %v78_v47 = vsel %vm76_vm3, %v66_v43, 2102212464  ;;  %v81_v48 = vsel %vm73_vm2, %v60_v41, %v63_v42  ;;  %v85_v49 = vsel %vm73_vm2, %v63_v42, %v66_v43 }
  0x3e   :  { %v79_v50 = vsel %vm75_vm5, %v63_v42, %v78_v47  ;;  %v82_v51 = vsel %vm76_vm3, %v69_v44, 920167782  ;;  %v86_v52 = vsel %vm76_vm3, %v72_v45, 1326507024 }
  0x3f   :  { %v83_v53 = vsel %vm75_vm5, %v66_v43, %v82_v51  ;;  %v87_v54 = vsel %vm75_vm5, %v69_v44, %v86_v52  ;;  %v80_v55 = vsel %vm74_vm4, %v77_v46, %v79_v50 }
  0x40   :  { %v84_v56 = vsel %vm74_vm4, %v81_v48, %v83_v53  ;;  %v88_v57 = vsel %vm74_vm4, %v85_v49, %v87_v54  ;;  %v96_v62 = vmul.u32 %v89_v40, %v80_v55 }
  0x41   :  { %v523_v58 = vmul.u32.u64.low %v89_v40, %v88_v57  ;;  %v524_v59 = vmul.u32.u64.high %v89_v40, %v88_v57, %v523_v58  ;;  %v526_v60 = vmul.u32.u64.low %v89_v40, %v84_v56  ;;  %v527_v61 = vmul.u32.u64.high %v89_v40, %v84_v56, %v526_v60 }
  0x42   :  { %v550_v56 = vmul.f32 0.2, %v514_v10 }
  0x43   :  { %vm98_vm6 = vc.u32 %v524_v59, %v526_v60  ;;  %v99_v63 = vadd.s32 1, %v527_v61  ;;  %v97_v18 = vadd.s32 %v526_v60, %v524_v59 }
  0x44   :  { %vm324_vm2 = vcmp.lt.f32.partialorder %v550_v56, 1.0 }
  0x45   :  { %v100_v3 = vsel %vm98_vm6, %v99_v63, %v527_v61 }
  0x46   :  { %v101_v4 = vadd.s32 %v100_v3, %v96_v62 }
  0x48   :  { %v102_v5 = vadd.s32 536870912, %v101_v4 }
  0x4a   :  { %v103_v6 = vshrl.u32 %v102_v5, 30  ;;  %v320_v5 = vmul.f32 %v550_v56, %v550_v56 }
  0x4c   :  { %v104_v8 = vshll.u32 %v103_v6, 30  ;;  %v127_v30 = vsub.s32 4, %v103_v6 }
  0x4e   :  { %v105_v12 = vsub.s32 %v101_v4, %v104_v8  ;;  %v128_v33 = vsel %vm43_vm8, %v127_v30, %v103_v6  ;;  %v332_v8 = vmul.f32 336.0, %v550_v56 }
  0x4f   :  { %v130_v36 = vsel %vm42_vm9, 0, %v128_v33 }
  0x50   :  { %v107_v13 = vsub.s32 0, %v105_v12  ;;  %v134_v37 = vadd.s32 3, %v130_v36  ;;  %v238_v39 = vand.u32 3, %v130_v36 }
  0x52   :  { %v383_v15 = vmin.u32 %v107_v13, %v105_v12  ;;  %v135_v38 = vand.u32 3, %v134_v37  ;;  %vm243_vm11 = vcmp.eq.s32.totalorder %v238_v39, 2  ;;  %vm240_vm13 = vcmp.eq.s32.totalorder %v238_v39, 0 }
  0x53   :  { %vm239_vm15 = vcmp.lt.s32.totalorder %v238_v39, 2 }
  0x54   :  { %v109_v16 = vclz %v383_v15  ;;  %vm140_vm10 = vcmp.eq.s32.totalorder %v135_v38, 2  ;;  %vm137_vm12 = vcmp.eq.s32.totalorder %v135_v38, 0  ;;  %vm136_vm14 = vcmp.lt.s32.totalorder %v135_v38, 2 }
  0x56   :  { %v384_v17 = vadd.s32 4294967294, %v109_v16 }
  0x58   :  { %vm385_vm7 = vcmp.lt.s32.totalorder %v384_v17, 0 }
  0x59   :  { %v112_v19 = vsel %vm385_vm7, 0, %v384_v17 }
  0x5a   :  { %v113_v20 = vsub.s32 32, %v112_v19  ;;  %v114_v21 = vshll.u32 %v105_v12, %v112_v19  ;;  %v117_v22 = vsub.s32 4294967266, %v112_v19 }
  0x5c   :  { %v115_v23 = vshrl.u32 %v97_v18, %v113_v20  ;;  %v118_v24 = vadd.s32 127, %v117_v22  ;;  %v321_v20 = vmul.f32 %v320_v5, %v320_v5 }
  0x5e   :  { %v116_v25 = vor.u32 %v115_v23, %v114_v21  ;;  %v119_v26 = vshll.u32 %v118_v24, 23  ;;  %v333_v23 = vsub.f32 168.0, %v332_v8  ;;  %v334_v24 = vmul.f32 168.0, %v320_v5 }
  0x5f   :  { %v322_v37 = vmul.f32 %v321_v20, %v550_v56 }
  0x60   :  { %v120_v27 = vor.u32 4788187, %v119_v26  ;;  %v123_v28 = vcvt.s32.f32 %v116_v25  ;;  %v335_v38 = vadd.f32 %v334_v24, %v333_v23 }
  0x62   :  { %v121_v29 = vand.u32 2147483647, %v120_v27 }
  0x64   :  { %v124_v31 = vmul.f32 %v123_v28, %v121_v29 }
  0x66   :  { %v125_v32 = vxor.u32 2147483648, %v124_v31 }
  0x68   :  { %v126_v34 = vsel %vm43_vm8, %v125_v32, %v124_v31 }
  0x69   :  { %v129_v35 = vsel %vm42_vm9, %v517_v11, %v126_v34  ;;  %v325_v34 = vmul.f32 48.0, %v550_v56 }
  0x6a   :  { %406 = vcosq.f32 %v129_v35 }
  0x6b   :  { %408 = vsinq.f32 %v129_v35 }
  0x74   :  { %v407_v40 = vpop.eup %406 }
  0x75   :  { %v409_v41 = vpop.eup %408  ;;  %v141_v42 = vxor.u32 2147483648, %v407_v40 }
  0x76   :  { %v138_v14 = vxor.u32 2147483648, %v409_v41 }
  0x77   :  { %v142_v43 = vsel %vm140_vm10, %v141_v42, %v409_v41  ;;  %v245_v44 = vsel %vm243_vm11, %v141_v42, %v409_v41 }
  0x78   :  { %v139_v45 = vsel %vm137_vm12, %v407_v40, %v138_v14  ;;  %v242_v46 = vsel %vm240_vm13, %v407_v40, %v138_v14 }
  0x79   :  { %v143_v47 = vsel %vm136_vm14, %v139_v45, %v142_v43  ;;  %v246_v48 = vsel %vm239_vm15, %v242_v46, %v245_v44  ;;  %v326_v45 = vsub.f32 28.0, %v325_v34  ;;  %v327_v46 = vmul.f32 21.0, %v320_v5 }
  0x7a   :  { %v538_v49 = vsel %vm133_vm1, nan, %v143_v47  ;;  %v540_v50 = vsel %vm133_vm1, nan, %v246_v48 }
  0x7b   :  { %v250_v51 = vmul.f32 %v540_v50, %v538_v49  ;;  %v252_v52 = vmul.f32 %v540_v50, %v540_v50  ;;  %v253_v53 = vmul.f32 %v538_v49, %v538_v49  ;;  %v248_v54 = vmul.f32 -0.19667584, %v538_v49 }
  0x7c   :  { %v249_v57 = vmul.f32 -0.19667584, %v540_v50 }
  0x7d   :  { %v251_v11 = vadd.f32 %v250_v51, %v250_v51  ;;  %v254_v55 = vsub.f32 %v252_v52, %v253_v53  ;;  %v336_v51 = vmul.f32 %v335_v38, %v322_v37 }
  0x7f   :  { %v255_v58 = vmul.f32 0.1975804, %v251_v11  ;;  %v259_v59 = vmul.f32 %v251_v11, %v540_v50  ;;  %v263_v60 = vmul.f32 %v251_v11, %v538_v49  ;;  %v257_v61 = vmul.f32 0.3951608, %v254_v55 }
  0x80   :  { %v260_v62 = vmul.f32 %v254_v55, %v538_v49  ;;  %v262_v63 = vmul.f32 %v254_v55, %v540_v50 }
  0x81   :  { %v256_v6 = vadd.f32 %v255_v58, %v248_v54  ;;  %v258_v10 = vadd.f32 %v257_v61, %v249_v57 }
  0x82   :  { %v261_v3 = vadd.f32 %v260_v62, %v259_v59  ;;  %v264_v4 = vsub.f32 %v262_v63, %v263_v60  ;;  %v323_v59 = vmul.f32 %v322_v37, %v550_v56  ;;  %v328_v60 = vadd.f32 %v327_v46, %v326_v45 }
  0x84   :  { %v265_v12 = vmul.f32 0.5319196, %v261_v3  ;;  %v267_v13 = vmul.f32 1.5957589, %v264_v4  ;;  %v269_v15 = vmul.f32 %v261_v3, %v540_v50  ;;  %v270_v16 = vmul.f32 %v264_v4, %v538_v49 }
  0x85   :  { %v272_v17 = vmul.f32 %v264_v4, %v540_v50  ;;  %v273_v18 = vmul.f32 %v261_v3, %v538_v49  ;;  %v337_v4 = vsub.f32 0.0, %v336_v51 }
  0x86   :  { %v271_v19 = vadd.f32 %v270_v16, %v269_v15  ;;  %v266_v21 = vadd.f32 %v265_v12, %v256_v6  ;;  %v268_v25 = vadd.f32 %v267_v13, %v258_v10  ;;  %v329_v15 = vmul.f32 %v328_v60, %v323_v59 }
  0x87   :  { %v274_v22 = vsub.f32 %v272_v17, %v273_v18  ;;  %v338_v20 = vmul.f32 0.2, %v337_v4 }
  0x88   :  { %v275_v26 = vmul.f32 -0.25551608, %v271_v19  ;;  %v279_v27 = vmul.f32 %v271_v19, %v540_v50  ;;  %v283_v28 = vmul.f32 %v271_v19, %v538_v49  ;;  %v330_v24 = vsub.f32 1.0, %v329_v15 }
  0x89   :  { %v277_v29 = vmul.f32 -1.0220643, %v274_v22  ;;  %v280_v30 = vmul.f32 %v274_v22, %v538_v49  ;;  %v282_v31 = vmul.f32 %v274_v22, %v540_v50 }
  0x8a   :  { %v276_v35 = vadd.f32 %v275_v26, %v266_v21  ;;  %v39_v21 = vmul.f32 %v511_v9, %v511_v9 }
  0x8b   :  { %v281_v32 = vadd.f32 %v280_v30, %v279_v27  ;;  %v284_v33 = vsub.f32 %v282_v31, %v283_v28  ;;  %v278_v36 = vadd.f32 %v277_v29, %v268_v25  ;;  %v341_v25 = vmul.f32 0.62831855, %v511_v9 }
  0x8c   :  { %v339_v27 = vsel %vm324_vm2, %v338_v20, 0.0  ;;  %v331_v29 = vsel %vm324_vm2, %v330_v24, 0.0 }
  0x8d   :  { %v285_v39 = vmul.f32 -0.7482638, %v281_v32  ;;  %v287_v40 = vmul.f32 -3.741319, %v284_v33  ;;  %v289_v41 = vmul.f32 %v281_v32, %v540_v50  ;;  %v290_v42 = vmul.f32 %v284_v33, %v538_v49 }
  0x8e   :  { %v292_v14 = vmul.f32 %v284_v33, %v540_v50  ;;  %v293_v43 = vmul.f32 %v281_v32, %v538_v49  ;;  %v29_v33 = vld [vmem:[#allocation2 + $0x18] sm:$0xff] }
  0x8f   :  { %v291_v44 = vadd.f32 %v290_v42, %v289_v41  ;;  %v286_v47 = vadd.f32 %v285_v39, %v276_v35  ;;  %v288_v52 = vadd.f32 %v287_v40, %v278_v36 }
  0x90   :  { %v294_v48 = vsub.f32 %v292_v14, %v293_v43 }
  0x91   :  { %v295_v53 = vmul.f32 0.2833231, %v291_v44  ;;  %v299_v11 = vmul.f32 %v291_v44, %v540_v50  ;;  %v303_v54 = vmul.f32 %v291_v44, %v538_v49 }
  0x92   :  { %v297_v55 = vmul.f32 1.6999387, %v294_v48  ;;  %v300_v57 = vmul.f32 %v294_v48, %v538_v49  ;;  %v302_v58 = vmul.f32 %v294_v48, %v540_v50 }
  0x93   :  { %v296_v61 = vadd.f32 %v295_v53, %v286_v47 }
  0x94   :  { %v301_v62 = vadd.f32 %v300_v57, %v299_v11  ;;  %v304_v63 = vsub.f32 %v302_v58, %v303_v54  ;;  %v298_v3 = vadd.f32 %v297_v55, %v288_v52 }
  0x96   :  { %v305_v5 = vmul.f32 0.46258035, %v301_v62  ;;  %v307_v6 = vmul.f32 3.2380626, %v304_v63  ;;  %v309_v10 = vmul.f32 %v301_v62, %v540_v50  ;;  %v310_v8 = vmul.f32 %v304_v63, %v538_v49 }
  0x97   :  { %v312_v12 = vmul.f32 %v304_v63, %v540_v50  ;;  %v313_v13 = vmul.f32 %v301_v62, %v538_v49 }
  0x98   :  { %v306_v16 = vadd.f32 %v305_v5, %v296_v61  ;;  %v311_v17 = vadd.f32 %v310_v8, %v309_v10  ;;  %v308_v18 = vadd.f32 %v307_v6, %v298_v3 }
  0x99   :  { %v314_v19 = vsub.f32 %v312_v12, %v313_v13 }
  0x9a   :  { %v315_v22 = vmul.f32 -0.18832272, %v311_v17 }
  0x9b   :  { %v317_v23 = vmul.f32 -1.5065818, %v314_v19 }
  0x9c   :  { %v316_v26 = vadd.f32 %v315_v22, %v306_v16 }
  0x9d   :  { %v318_v50 = vadd.f32 %v317_v23, %v308_v18 }
  0x9e   :  { %v340_v49 = vmul.f32 %v511_v9, %v316_v26  ;;  %v343_v28 = vmul.f32 %v316_v26, %v39_v21 }
  0x9f   :  { %v342_v30 = vmul.f32 %v341_v25, %v318_v50 }
  0xa0   :  { %v347_v31 = vmul.f32 %v340_v49, %v339_v27  ;;  %v345_v32 = vmul.f32 %v340_v49, %v331_v29 }
  0xa1   :  { %v344_v34 = vsub.f32 %v342_v30, %v343_v28 }
  0xa2   :  { %v349_v35 = vmul.f32 %v345_v32, %v29_v33 }
  0xa3   :  { %v346_v36 = vmul.f32 %v344_v34, %v331_v29 }
  0xa4   :  { %v350_v56 = vsel %vm35_vm0, %v349_v35, 0.0 }
  0xa5   :  { %v348_v37 = vadd.f32 %v347_v31, %v346_v36  ;;  %364 = vst [vmem:[#allocation5 + $0x18] sm:$0xff] %v350_v56 }
  0xa7   :  { %v351_v38 = vmul.f32 %v348_v37, %v29_v33 }
  0xa9   :  { %v352_v39 = vsub.f32 0.0, %v351_v38 }
  0xab   :  { %v353_v40 = vmul.f32 %v511_v9, %v352_v39 }
  0xad   :  { %v354_v41 = vsel %vm35_vm0, %v353_v40, 0.0 }
  0xae   :  { %v355_v42 = vmul.f32 %v354_v41, %v493_v0  ;;  %v357_v14 = vmul.f32 %v354_v41, %v495_v1  ;;  %v360_v43 = vmul.f32 %v354_v41, %v497_v2 }
  0xb0   :  { %356 = vst [vmem:[#allocation5] sm:$0xff] %v355_v42  ;;  %359 = vst [vmem:[#allocation5 + $0x8] sm:$0xff] %v357_v14 }
  0xb1   :  { %362 = vst [vmem:[#allocation5 + $0x10] sm:$0xff] %v360_v43 }
  0xb2   :  { %443 = shalt.err (!%p440_p12)
}
  0xb3   :  { %s444_s24 = scalar_lea.hbm %s612_s1, 512 }
  0xb4   :  { %p445_p13 = scmp.ne.s32.totalorder %s612_s1, %s444_s24  ;;  %p448_p0 = scmp.lt.u32.totalorder %s444_s24, %s612_s1 }
  0xb6   :  { %p450_p1 = pnand %p448_p0, %p445_p13 }
  0xb8   :  { %453 = shalt.err (!%p450_p1)
}
  0xb9   :  { %376 = dma.vmem_to_hbm [thread:$0]  %s371_s20, 512, %s612_s1, [#allocation4], %s459_s16, %s459_s16, %s460_s17  }
  0xba   :  { %456 = dma.done.wait [#allocation4], 512  }
  0xbb   :  { %457 = vsyncadd [#allocation4], 4294966784 }
  0xbc   :  { %380 = vsyncpa [#allocation3], 1 }
  0xbd   :  { %381 = vsyncpa [#allocation4], 1 }

</bundles_post_ra>
